<compile_context>
chip_gen: v6e
topology: v6e:2x2x1
jax: 0.10.0
libtpu: 0.0.40
codegen_flags: <defaults>
</compile_context>

<pallas_src>
import jax
import jax.numpy as jnp
from jax.experimental import pallas as pl
from jax.experimental.pallas import tpu as pltpu


def _round_up(x, m):
    return ((x + m - 1) // m) * m


def _embedding_gather_kernel(ids_ref, table_ref, out_ref, sem):
    # ids_ref  : (T_pad,) int32 token ids in SMEM (scalar prefetch)
    # table_ref: (V, H)   embedding table, left in HBM (memory_space=pl.ANY)
    # out_ref  : (TT, H)  output tile in VMEM (written purely via DMA)
    # sem      : scalar DMA semaphore shared by all row copies of this tile
    tt = out_ref.shape[0]
    base = pl.program_id(0) * tt

    # Issue one row DMA per token in this tile; they all run concurrently.
    @pl.loop(0, tt)
    def _start(t):
        tok = ids_ref[base + t]
        pltpu.make_async_copy(
            table_ref.at[pl.ds(tok, 1), :],
            out_ref.at[pl.ds(t, 1), :],
            sem,
        ).start()

    # Every copy has identical size, so wait once per issued copy with a
    # same-shaped descriptor (addresses are irrelevant for the wait).
    @pl.loop(0, tt)
    def _wait(t):
        pltpu.make_async_copy(
            table_ref.at[pl.ds(0, 1), :],
            out_ref.at[pl.ds(0, 1), :],
            sem,
        ).wait()


def base_encoder_forward(seqs, att_mask, emb_table, *, token_tile=256):
    """Pallas equivalent of BaseEncoder.forward (nn.Embedding lookup).

    Args:
      seqs:      (B, L) int token indices
      att_mask:  (B, L) attention mask (unused by forward, kept for parity)
      emb_table: (V, H) embedding weights (any float dtype; gather is exact,
                 bf16 simply halves the gathered bytes)
    Returns:
      (B, L, H) embeddings in emb_table.dtype
    """
    del att_mask  # forward() ignores the mask, exactly like the PyTorch module
    B, L = seqs.shape
    V, H = emb_table.shape

    # Token tiling: flatten (B, L) -> (T,). 256 tokens per grid step amortizes
    # the per-step overhead; small inputs collapse to a single full tile.
    T = B * L
    TT = min(token_tile, _round_up(T, 8))
    T_pad = _round_up(T, TT)
    n_tok = T_pad // TT

    ids = seqs.reshape(-1).astype(jnp.int32)
    # Clamp so a bad id can never generate an out-of-bounds HBM DMA.
    ids = jnp.clip(ids, 0, V - 1)
    if T_pad != T:
        ids = jnp.pad(ids, (0, T_pad - T))  # pad ids gather row 0, dropped below

    out = pl.pallas_call(
        _embedding_gather_kernel,
        out_shape=jax.ShapeDtypeStruct((T_pad, H), emb_table.dtype),
        grid_spec=pltpu.PrefetchScalarGridSpec(
            num_scalar_prefetch=1,
            grid=(n_tok,),
            in_specs=[pl.BlockSpec(memory_space=pl.ANY)],   # table stays in HBM
            out_specs=pl.BlockSpec((TT, H), lambda i, ids: (i, 0)),
            scratch_shapes=[pltpu.SemaphoreType.DMA],
        ),
        compiler_params=pltpu.CompilerParams(
            dimension_semantics=("parallel",)),
    )(ids, emb_table)

    return out[:T].reshape(B, L, H)


if __name__ == "__main__":
    key = jax.random.PRNGKey(0)
    k_emb, k_seq, k_emb2, k_seq2 = jax.random.split(key, 4)

    # Small config consistent with the module: vocab of 28 tokens + [UNK] +
    # [PAD] -> num_token = 30, word_emb_size = hidden_size = 32, B=2, L=8.
    num_token, word_emb_size = 30, 32
    B, L = 2, 8
    emb_table = jax.random.normal(k_emb, (num_token, word_emb_size),
                                  dtype=jnp.float32)
    seqs = jax.random.randint(k_seq, (B, L), 0, num_token, dtype=jnp.int32)
    att_mask = jnp.ones((B, L), dtype=jnp.int32)

    out = jax.block_until_ready(base_encoder_forward(seqs, att_mask, emb_table))
    ref = emb_table[seqs]
    assert out.shape == (B, L, word_emb_size)
    assert out.dtype == emb_table.dtype
    assert jnp.array_equal(out, ref), "mismatch vs reference gather (f32)"

    # Second config: multiple token tiles + padding + bf16 table (gather is
    # exact in any dtype; bf16 halves the gathered HBM bytes).
    V2, H2, B2, L2 = 512, 128, 3, 100
    tbl2 = jax.random.normal(k_emb2, (V2, H2), jnp.float32).astype(jnp.bfloat16)
    seqs2 = jax.random.randint(k_seq2, (B2, L2), 0, V2, dtype=jnp.int32)
    out2 = jax.block_until_ready(
        base_encoder_forward(seqs2, jnp.ones((B2, L2), jnp.int32), tbl2))
    ref2 = tbl2[seqs2]
    assert out2.shape == (B2, L2, H2)
    assert jnp.array_equal(out2, ref2), "mismatch vs reference gather (bf16)"

    print("KERNEL_OK")
</pallas_src>

<mosaic_0001>
module attributes {stable_mosaic.version = 11 : i64} {
  func.func @_embedding_gather_kernel(%arg0: i32, %arg1: memref<16xi32, #tpu.memory_space<smem>>, %arg2: memref<30x32xf32, #tpu.memory_space<any>>, %arg3: memref<16x32xf32, #tpu.memory_space<vmem>>, %arg4: memref<!tpu.dma_semaphore, #tpu.memory_space<semaphore_mem>>) attributes {dimension_semantics = [#tpu.dimension_semantics<parallel>], iteration_bounds = array<i64: 1>, scalar_prefetch = 1 : i64, scratch_operands = 1 : i64, tpu.core_type = #tpu.core_type<tc>, window_params = [{}, {transform_indices = @transform_1, window_bounds = array<i64: 16, 32>}]} {
    %c16_i32 = arith.constant 16 : i32
    %0 = arith.muli %arg0, %c16_i32 : i32
    %c0_i32 = arith.constant 0 : i32
    %c16_i32_0 = arith.constant 16 : i32
    %1 = arith.addi %c0_i32, %c16_i32_0 : i32
    %c1_i32 = arith.constant 1 : i32
    scf.for %arg5 = %c0_i32 to %1 step %c1_i32  : i32 {
      %c1_i32_5 = arith.constant 1 : i32
      %3 = arith.muli %arg5, %c1_i32_5 : i32
      %c0_i32_6 = arith.constant 0 : i32
      %4 = arith.addi %c0_i32_6, %3 : i32
      %5 = arith.addi %0, %4 : i32
      %6 = arith.index_cast %5 : i32 to index
      %7 = memref.load %arg1[%6] : memref<16xi32, #tpu.memory_space<smem>>
      %c0_i32_7 = arith.constant 0 : i32
      %8 = tpu.memref_slice %arg2[%7, %c0_i32_7] : memref<30x32xf32, #tpu.memory_space<any>> -> memref<1x32xf32, #tpu.memory_space<any>>
      %c0_i32_8 = arith.constant 0 : i32
      %9 = tpu.memref_slice %arg3[%4, %c0_i32_8] : memref<16x32xf32, #tpu.memory_space<vmem>> -> memref<1x32xf32, #tpu.memory_space<vmem>>
      tpu.enqueue_dma source(%8 : memref<1x32xf32, #tpu.memory_space<any>>) target(%9 : memref<1x32xf32, #tpu.memory_space<vmem>>) target_semaphore(%arg4 : memref<!tpu.dma_semaphore, #tpu.memory_space<semaphore_mem>>)
    }
    %c16_i32_1 = arith.constant 16 : i32
    %c0_i32_2 = arith.constant 0 : i32
    %c16_i32_3 = arith.constant 16 : i32
    %2 = arith.addi %c0_i32_2, %c16_i32_3 : i32
    %c1_i32_4 = arith.constant 1 : i32
    scf.for %arg5 = %c0_i32_2 to %2 step %c1_i32_4  : i32 {
      %c0_i32_5 = arith.constant 0 : i32
      %c0_i32_6 = arith.constant 0 : i32
      %3 = tpu.memref_slice %arg2[%c0_i32_5, %c0_i32_6] : memref<30x32xf32, #tpu.memory_space<any>> -> memref<1x32xf32, #tpu.memory_space<any>>
      %c0_i32_7 = arith.constant 0 : i32
      %c0_i32_8 = arith.constant 0 : i32
      %4 = tpu.memref_slice %arg3[%c0_i32_7, %c0_i32_8] : memref<16x32xf32, #tpu.memory_space<vmem>> -> memref<1x32xf32, #tpu.memory_space<vmem>>
      tpu.wait_dma2 semaphore(%arg4 : memref<!tpu.dma_semaphore, #tpu.memory_space<semaphore_mem>>) src(%3 : memref<1x32xf32, #tpu.memory_space<any>>) dst(%4 : memref<1x32xf32, #tpu.memory_space<vmem>>)
    }
    return
  }
  func.func @transform_1(%arg0: i32, %arg1: memref<16xi32, #tpu.memory_space<smem>>) -> (i32, i32) {
    %c0_i32 = arith.constant 0 : i32
    %c0_i32_0 = arith.constant 0 : i32
    return %arg0, %c0_i32 : i32, i32
  }
}

</mosaic_0001>

<bundles_post_ra>
// kernel: tpu_custom_call.1
= control target key start
LH: loop header
LB: loop body
LE: loop exit
PB: predicated region body
PF: predicated region fallthrough
CT: control target
= control target key end

     0   :  { %s173_s9 = smov [#allocation4]   ;;  %s225_s0 = inlined_call_operand.hbm [shape: s32[16], index: 0, kind: input, shape index: {}]   ;;  %s226_s1 = inlined_call_operand.hbm [shape: f32[30,32], index: 1, kind: input, shape index: {}]   ;;  %s227_s2 = inlined_call_operand.hbm [shape: f32[16,32], index: 2, kind: output, shape index: {}]  }
   0x1   :  { %8 = dma.hbm_to_smem %s225_s0, 16, %s173_s9, [#allocation3] }
   0x2   :  { %159 = dma.done.wait [#allocation3], 16 }
   0x3   :  { %160 = vsyncadd [#allocation3], 4294967280 }
   0x4   :  { %10 = sfence }
   0x5   :  { %11 = vsyncpa [#allocation6], 0  ;;  %s195_s12 = smov 0  }
   0x6 LB: > { %s20_s13 = sld [smem:[#allocation4 + %s167_s12]]  ;;  %s23_s14 = scalar_lea.vmem [#allocation5], %s167_s12  ;;  %s167_s12 = sphi %s195_s12, %s18_s12  }
   0x7   : > { %s31_s15 = sshll.u32 %s23_s14, 4  ;;  %s111_s22 = scalar_lea.hbm %s226_s1, 512  ;;  %s32_s15 = int_to_ptr.vmem [resolvable:$true] %s31_s15 }
   0xc   : > { %s79_s16 = sshll.u32 %s20_s13, 4 }
   0xd   : > { %s22_s18 = scalar_lea.hbm %s226_s1, %s79_s16 }
   0xe   : > { %s109_s19 = scalar_lea.hbm %s22_s18, 16  ;;  %p112_p1 = scmp.lt.s32.totalorder %s22_s18, %s226_s1 }
   0xf   : > { %p110_p0 = scmp.ne.s32.totalorder %s22_s18, %s109_s19  ;;  %p113_p2 = scmp.lt.s32.totalorder %s111_s22, %s109_s19 }
  0x11   : > { %p114_p3 = por %p113_p2, %p112_p1 }
  0x13   : > { %p115_p4 = pnand %p114_p3, %p110_p0 }
  0x15   : > { %118 = shalt.err (!%p115_p4)  }
  0x16   : > { %s119_s25 = scalar_lea.vmem %s32_s15, 16  ;;  %s174_s26 = smov [#allocation5]  }
  0x17   : > { %p120_p5 = scmp.ne.s32.totalorder %s32_s15, %s119_s25  ;;  %s121_s27 = sshll.u32 %s174_s26, 4  ;;  %s211_s27 = int_to_ptr.vmem [resolvable:$false] %s121_s27 }
  0x18   : > { %s123_s28 = scalar_lea.vmem %s211_s27, 256  ;;  %p124_p6 = scmp.lt.s32.totalorder %s32_s15, %s211_s27 }
  0x19   : > { %p125_p7 = scmp.lt.s32.totalorder %s123_s28, %s119_s25 }
  0x1b   : > { %p126_p8 = por %p125_p7, %p124_p6 }
  0x1d   : > { %p127_p9 = pnand %p126_p8, %p120_p5 }
  0x1f   : > { %130 = shalt.err (!%p127_p9)  }
  0x20   : > { %34 = dma.hbm_to_vmem [thread:$0]  %s22_s18, 16, %s32_s15, [#allocation2] }
  0x21   : > { %s18_s12 = sadd.s32 1, %s167_s12  }
  0x22   : > { %p15_p10 = scmp.ge.s32.totalorder %s18_s12, 16  }
  0x23   :  { %s169_s29 = smov (%p15_p10), 0  }
  0x24   :  { %17 = sbr.rel (!%p15_p10) target bundleno = 6 (0x6), region = 40 }
  0x29 LB: > { %161 = dma.done.wait [#allocation2], 16  ;;  %s171_s29 = sphi %s169_s29, %s40_s29  }
  0x2a   : > { %162 = vsyncadd [#allocation2], 4294967280  ;;  %s40_s29 = sadd.s32 1, %s171_s29  }
  0x2b   : > { %p37_p11 = scmp.ge.s32.totalorder %s40_s29, 16  }
  0x2c   :  { %p132_p12 = scmp.ne.s32.totalorder (%p37_p11), %s211_s27, %s123_s28  ;;  %p136_p13 = scmp.lt.s32.totalorder (%p37_p11), %s211_s27, %s211_s27 }
  0x2d   :  { %39 = sbr.rel (!%p37_p11) target bundleno = 41 (0x29), region = 51  ;;  %p137_p0 = scmp.lt.s32.totalorder (%p37_p11), %s123_s28, %s123_s28 }
  0x2f   :  { %p138_p1 = por (%p37_p11), %p137_p0, %p136_p13 }
  0x31   :  { %p139_p2 = pnand (%p37_p11), %p138_p1, %p132_p12 }
  0x33   :  { %142 = shalt.err (!%p139_p2)
}
  0x34   :  { %s175_s30 = smov 128   ;;  %s176_s1 = smov 8  }
  0x35   :  { %55 = dma.vmem_to_hbm [thread:$0]  %s211_s27, 256, %s227_s2, [#allocation6], %s175_s30, %s175_s30, %s176_s1  }
  0x36   :  { %163 = dma.done.wait [#allocation6], 256  }
  0x37   :  { %164 = vsyncadd [#allocation6], 4294967040 }
  0x38   :  { %59 = vsyncpa [#allocation6], 1 }
  0x39   :  { %60 = vsyncmov [#allocation2] }
  0x3c   :  { %s61_s5 = vpop.sfrf %60 }
  0x3d   :  { %p80_p3 = scmp.ne.s32.totalorder %s61_s5, 0 }
  0x3f   :  { %65 = shalt.err (%p80_p3)  }

</bundles_post_ra>
